<compile_context>
chip_gen: v5e
topology: v5e:2x2
jax: 0.10.0
libtpu: 0.0.40
codegen_flags: <defaults>
</compile_context>

<pallas_src>
from functools import partial

import jax
import jax.numpy as jnp
from jax import lax
from jax.experimental import pallas as pl
from jax.experimental.pallas import tpu as pltpu


# ---------------------------------------------------------------------------
# Kernel: one grid step == one chunk of `chunk` GRU timesteps.
# Weights are VMEM-resident (constant index_map); the hidden state is carried
# in hout_ref, whose block index is constant across the time axis.
# ---------------------------------------------------------------------------
def char_rnn_kernel(gi_ref, h0_ref, wh_ref, bhn_ref, wd_ref, bd_ref,
                    logits_ref, hout_ref, hchunk_ref, *, seq_len, chunk):
    """
    gi_ref:     (Tc, Bp, 3*Hp) f32   precomputed input-path gates (+biases)
    h0_ref:     (Bp, Hp)       f32   initial hidden state
    wh_ref:     (Hp, 3*Hp)     bf16  fused hidden->hidden weights [r|z|n]
    bhn_ref:    (1, Hp)        f32   hidden bias of the n gate (not foldable)
    wd_ref:     (Hp, Op)       bf16  decoder weight
    bd_ref:     (1, Op)        f32   decoder bias
    logits_ref: (Tc, Bp, Op)   f32   per-chunk logits
    hout_ref:   (Bp, Hp)       f32   hidden-state carry / final hidden state
    hchunk_ref: (Tc, Bp, Hp)   f32   VMEM scratch: h_t for the whole chunk
    """
    c = pl.program_id(0)
    Bp, Hp = hout_ref.shape

    @pl.when(c == 0)
    def _():
        hout_ref[...] = h0_ref[...]

    wh = wh_ref[...]          # resident in VMEM across the whole grid
    bhn = bhn_ref[...]

    needs_mask = (seq_len % chunk) != 0   # static

    def step(t, h):
        gi = gi_ref[t]                                       # (Bp, 3Hp) f32
        # Single MXU matmul on the serial path; f32 accumulation.
        gh = jnp.dot(h.astype(jnp.bfloat16), wh,
                     preferred_element_type=jnp.float32)     # (Bp, 3Hp)
        # Lane-aligned (128-multiple) static slices: [r | z | n].
        r = jax.nn.sigmoid(gi[:, :Hp] + gh[:, :Hp])
        z = jax.nn.sigmoid(gi[:, Hp:2 * Hp] + gh[:, Hp:2 * Hp])
        n = jnp.tanh(gi[:, 2 * Hp:] + r * (gh[:, 2 * Hp:] + bhn))
        h_new = (1.0 - z) * n + z * h
        if needs_mask:
            # Steps beyond the true sequence length keep h unchanged.
            h_new = jnp.where(c * chunk + t < seq_len, h_new, h)
        hchunk_ref[t] = h_new
        return h_new

    h_final = lax.fori_loop(0, chunk, step, hout_ref[...], unroll=True)
    hout_ref[...] = h_final

    # Decoder for the whole chunk, off the serial path: one
    # (Tc*Bp, Hp) x (Hp, Op) matmul and one lane-dense f32 store.
    hc = hchunk_ref[...].reshape(chunk * Bp, Hp).astype(jnp.bfloat16)
    logits = jnp.dot(hc, wd_ref[...],
                     preferred_element_type=jnp.float32) + bd_ref[...]
    logits_ref[...] = logits.reshape(logits_ref.shape)


# ---------------------------------------------------------------------------
# Wrappers
# ---------------------------------------------------------------------------
def _round_up(x, m):
    return ((x + m - 1) // m) * m


def _gru_pallas(gi_all, h0, wh, bhn, wd, bd, *, seq_len, chunk):
    Tp, Bp, G = gi_all.shape        # G = 3 * Hp
    Hp = h0.shape[-1]
    Op = wd.shape[1]
    n_chunks = Tp // chunk

    kernel = partial(char_rnn_kernel, seq_len=seq_len, chunk=chunk)

    grid_spec = pltpu.PrefetchScalarGridSpec(
        num_scalar_prefetch=0,
        grid=(n_chunks,),
        in_specs=[
            pl.BlockSpec((chunk, Bp, G), lambda c: (c, 0, 0)),   # gi chunk
            pl.BlockSpec((Bp, Hp), lambda c: (0, 0)),            # h0
            pl.BlockSpec((Hp, G), lambda c: (0, 0)),             # wh (resident)
            pl.BlockSpec((1, Hp), lambda c: (0, 0)),             # bh_n
            pl.BlockSpec((Hp, Op), lambda c: (0, 0)),            # wd (resident)
            pl.BlockSpec((1, Op), lambda c: (0, 0)),             # bd
        ],
        out_specs=[
            pl.BlockSpec((chunk, Bp, Op), lambda c: (c, 0, 0)),  # logits chunk
            pl.BlockSpec((Bp, Hp), lambda c: (0, 0)),            # hidden carry
        ],
        scratch_shapes=[pltpu.VMEM((chunk, Bp, Hp), jnp.float32)],
    )

    return pl.pallas_call(
        kernel,
        out_shape=(
            jax.ShapeDtypeStruct((Tp, Bp, Op), jnp.float32),
            jax.ShapeDtypeStruct((Bp, Hp), jnp.float32),
        ),
        grid_spec=grid_spec,
        compiler_params=pltpu.CompilerParams(
            dimension_semantics=("arbitrary",)),   # serial time dependence
    )(gi_all, h0, wh, bhn, wd, bd)


@partial(jax.jit, static_argnames=("output_size", "chunk"))
def char_rnn_forward_seq(tokens_seq, hidden, padded, *, output_size, chunk=32):
    """Run T GRU steps with the Pallas kernel.

    tokens_seq: (T, B) int32; hidden: (1, B, H) f32.
    Returns (logits (T, B, O) f32, new_hidden (1, B, H) f32).
    """
    T, B = tokens_seq.shape
    H = hidden.shape[2]
    O = output_size
    Hp = padded["wh"].shape[0]
    Bp = max(8, _round_up(B, 8))
    Tc = min(chunk, T)
    Tp = _round_up(T, Tc)

    # Input projection hoisted off the recurrence: per-token lookup into the
    # precomputed (V, 3Hp) table of Embedding @ Wi (+ folded biases).
    gi = jnp.take(padded["gi_table"], tokens_seq, axis=0)     # (T, B, 3Hp) f32
    gi = jnp.pad(gi, ((0, Tp - T), (0, Bp - B), (0, 0)))
    h0 = jnp.pad(hidden[0].astype(jnp.float32),
                 ((0, Bp - B), (0, Hp - H)))

    logits_p, h_p = _gru_pallas(gi, h0,
                                padded["wh"], padded["bhn"],
                                padded["wd"], padded["bd"],
                                seq_len=T, chunk=Tc)

    # Strip time padding / padded batch rows / vocab columns / hidden lanes.
    return logits_p[:T, :B, :O], h_p[None, :B, :H]


def char_rnn_forward(tokens, hidden, padded, output_size):
    """Exact CharRNN.forward(input, hidden) semantics (single timestep)."""
    logits_seq, h_new = char_rnn_forward_seq(tokens[None], hidden, padded,
                                             output_size=output_size)
    return logits_seq[0], h_new


# ---------------------------------------------------------------------------
# Parameters
# ---------------------------------------------------------------------------
def init_params(key, vocab_size, hidden_size, output_size):
    """Synthetic parameters matching CharRNN(gru, n_layers=1) shapes."""
    ks = jax.random.split(key, 8)
    scale = 1.0 / jnp.sqrt(hidden_size)
    return {
        # nn.Embedding(input_size, hidden_size)
        "embedding": jax.random.normal(ks[0], (vocab_size, hidden_size),
                                       jnp.float32),
        # nn.GRU weights, pre-transposed and split per gate [r, z, n]
        "w_i": jax.random.uniform(ks[1], (3, hidden_size, hidden_size),
                                  jnp.float32, -scale, scale),
        "w_h": jax.random.uniform(ks[2], (3, hidden_size, hidden_size),
                                  jnp.float32, -scale, scale),
        "b_i": jax.random.uniform(ks[3], (3, 1, hidden_size),
                                  jnp.float32, -scale, scale),
        "b_h": jax.random.uniform(ks[4], (3, 1, hidden_size),
                                  jnp.float32, -scale, scale),
        # nn.Linear(hidden_size, output_size), stored transposed (H, O)
        "w_dec": jax.random.uniform(ks[5], (hidden_size, output_size),
                                    jnp.float32, -scale, scale),
        "b_dec": jax.random.uniform(ks[6], (1, output_size),
                                    jnp.float32, -scale, scale),
    }


def make_padded_params(params, hidden_size, output_size):
    """Precompute the input-path lookup table, fuse gate weights, pad to
    128-multiples, cast MXU operands to bf16.

    Note: zero-padded hidden lanes stay exactly zero because every padded
    weight row/column and bias lane is zero and h0 padding is zero.
    """
    H, O = hidden_size, output_size
    Hp = _round_up(H, 128)
    Op = _round_up(O, 128)
    V = params["embedding"].shape[0]

    def pad2(a, rows, cols):
        return jnp.pad(a, ((0, rows - a.shape[0]), (0, cols - a.shape[1])))

    # Folded biases: r,z get bi+bh (both additive); n gets bi only
    # (bh_n is multiplied by r, so it must stay on the hidden path).
    fold_bias = [params["b_i"][0] + params["b_h"][0],
                 params["b_i"][1] + params["b_h"][1],
                 params["b_i"][2]]

    E = params["embedding"]                                      # (V, H) f32
    gi_cols = []
    for g in range(3):
        col = E @ params["w_i"][g] + fold_bias[g]                # (V, H) f32
        gi_cols.append(pad2(col, V, Hp))
    gi_table = jnp.concatenate(gi_cols, axis=1)                  # (V, 3Hp)

    wh = jnp.concatenate([pad2(params["w_h"][g], Hp, Hp) for g in range(3)],
                         axis=1)                                 # (Hp, 3Hp)
    bhn = pad2(params["b_h"][2], 1, Hp)                          # (1, Hp)
    wd = pad2(params["w_dec"], Hp, Op)                           # (Hp, Op)
    bd = pad2(params["b_dec"], 1, Op)                            # (1, Op)

    return {
        "gi_table": gi_table.astype(jnp.float32),
        "wh": wh.astype(jnp.bfloat16),
        "bhn": bhn.astype(jnp.float32),
        "wd": wd.astype(jnp.bfloat16),
        "bd": bd.astype(jnp.float32),
    }


# ---------------------------------------------------------------------------
# Pure-JAX f32 reference (PyTorch GRU semantics) for correctness checks.
# ---------------------------------------------------------------------------
def _gru_step_ref(x, h, params):
    gi = jnp.einsum("bh,ghk->gbk", x, params["w_i"]) + params["b_i"]
    gh = jnp.einsum("bh,ghk->gbk", h, params["w_h"]) + params["b_h"]
    r = jax.nn.sigmoid(gi[0] + gh[0])
    z = jax.nn.sigmoid(gi[1] + gh[1])
    n = jnp.tanh(gi[2] + r * gh[2])
    return (1.0 - z) * n + z * h


def char_rnn_ref(tokens_seq, hidden, params):
    x_seq = jnp.take(params["embedding"], tokens_seq, axis=0)   # (T,B,H) f32
    h = hidden[0]
    logits = []
    for t in range(tokens_seq.shape[0]):
        h = _gru_step_ref(x_seq[t], h, params)
        logits.append(h @ params["w_dec"] + params["b_dec"])
    return jnp.stack(logits), h[None]


# ---------------------------------------------------------------------------
if __name__ == "__main__":
    VOCAB, HIDDEN, BATCH, SEQ = 64, 32, 2, 8

    key = jax.random.PRNGKey(0)
    pkey, tkey, skey, lkey = jax.random.split(key, 4)

    params = init_params(pkey, VOCAB, HIDDEN, VOCAB)
    padded = make_padded_params(params, HIDDEN, VOCAB)

    hidden0 = jnp.zeros((1, BATCH, HIDDEN), jnp.float32)   # init_hidden (GRU)

    # --- single-step forward: exact CharRNN.forward semantics ---
    tokens = jax.random.randint(tkey, (BATCH,), 0, VOCAB, dtype=jnp.int32)
    logits, hidden1 = char_rnn_forward(tokens, hidden0, padded, VOCAB)
    jax.block_until_ready((logits, hidden1))
    assert logits.shape == (BATCH, VOCAB)
    assert hidden1.shape == (1, BATCH, HIDDEN)

    ref_logits1, ref_hidden1 = char_rnn_ref(tokens[None], hidden0, params)
    assert float(jnp.max(jnp.abs(logits - ref_logits1[0]))) < 0.1
    assert float(jnp.max(jnp.abs(hidden1 - ref_hidden1))) < 0.1

    # --- multi-step: SEQ timesteps inside one kernel chunk ---
    tokens_seq = jax.random.randint(skey, (SEQ, BATCH), 0, VOCAB,
                                    dtype=jnp.int32)
    logits_seq, hidden_T = char_rnn_forward_seq(tokens_seq, hidden0, padded,
                                                output_size=VOCAB)
    jax.block_until_ready((logits_seq, hidden_T))
    assert logits_seq.shape == (SEQ, BATCH, VOCAB)
    assert hidden_T.shape == (1, BATCH, HIDDEN)

    ref_lseq, ref_hT = char_rnn_ref(tokens_seq, hidden0, params)
    assert float(jnp.max(jnp.abs(logits_seq - ref_lseq))) < 0.1
    assert float(jnp.max(jnp.abs(hidden_T - ref_hT))) < 0.1

    # --- long sequence: multiple chunks + time-padding mask path ---
    LSEQ, CHUNK = 37, 16            # grid of 3 chunks, last chunk masked
    tokens_long = jax.random.randint(lkey, (LSEQ, BATCH), 0, VOCAB,
                                     dtype=jnp.int32)
    logits_l, hidden_L = char_rnn_forward_seq(tokens_long, hidden0, padded,
                                              output_size=VOCAB, chunk=CHUNK)
    jax.block_until_ready((logits_l, hidden_L))
    ref_ll, ref_hL = char_rnn_ref(tokens_long, hidden0, params)
    assert float(jnp.max(jnp.abs(logits_l - ref_ll))) < 0.2
    assert float(jnp.max(jnp.abs(hidden_L - ref_hL))) < 0.2

    print("KERNEL_OK")
</pallas_src>

<mosaic_0001>
module attributes {stable_mosaic.version = 11 : i64} {
  func.func @char_rnn_kernel(%arg0: i32, %arg1: memref<1x8x384xf32, #tpu.memory_space<vmem>>, %arg2: memref<8x128xf32, #tpu.memory_space<vmem>>, %arg3: memref<128x384xbf16, #tpu.memory_space<vmem>>, %arg4: memref<1x128xf32, #tpu.memory_space<vmem>>, %arg5: memref<128x128xbf16, #tpu.memory_space<vmem>>, %arg6: memref<1x128xf32, #tpu.memory_space<vmem>>, %arg7: memref<1x8x128xf32, #tpu.memory_space<vmem>>, %arg8: memref<8x128xf32, #tpu.memory_space<vmem>>, %arg9: memref<1x8x128xf32, #tpu.memory_space<vmem>>) attributes {dimension_semantics = [#tpu.dimension_semantics<arbitrary>], iteration_bounds = array<i64: 1>, scalar_prefetch = 0 : i64, scratch_operands = 1 : i64, tpu.core_type = #tpu.core_type<tc>, window_params = [{transform_indices = @transform_0, window_bounds = array<i64: 1, 8, 384>}, {pipeline_mode = #tpu.pipeline_mode<synchronous>, transform_indices = @transform_1, window_bounds = array<i64: 8, 128>}, {pipeline_mode = #tpu.pipeline_mode<synchronous>, transform_indices = @transform_2, window_bounds = array<i64: 128, 384>}, {pipeline_mode = #tpu.pipeline_mode<synchronous>, transform_indices = @transform_3, window_bounds = array<i64: 1, 128>}, {pipeline_mode = #tpu.pipeline_mode<synchronous>, transform_indices = @transform_4, window_bounds = array<i64: 128, 128>}, {pipeline_mode = #tpu.pipeline_mode<synchronous>, transform_indices = @transform_5, window_bounds = array<i64: 1, 128>}, {transform_indices = @transform_6, window_bounds = array<i64: 1, 8, 128>}, {pipeline_mode = #tpu.pipeline_mode<synchronous>, transform_indices = @transform_7, window_bounds = array<i64: 8, 128>}]} {
    %c0_i32 = arith.constant 0 : i32
    %0 = arith.cmpi eq, %arg0, %c0_i32 : i32
    %1 = arith.extui %0 : i1 to i32
    %c0_i32_0 = arith.constant 0 : i32
    %2 = arith.cmpi ne, %1, %c0_i32_0 : i32
    scf.if %2 {
      %c0_27 = arith.constant 0 : index
      %c0_28 = arith.constant 0 : index
      %54 = vector.load %arg2[%c0_27, %c0_28] : memref<8x128xf32, #tpu.memory_space<vmem>>, vector<8x128xf32>
      %c0_29 = arith.constant 0 : index
      %c0_30 = arith.constant 0 : index
      %55 = vector.load %arg8[%c0_29, %c0_30] : memref<8x128xf32, #tpu.memory_space<vmem>>, vector<8x128xf32>
      tpu.vector_store %arg8[%c0_29, %c0_30], %54 {strides = array<i32>} : memref<8x128xf32, #tpu.memory_space<vmem>>, vector<8x128xf32>,
    } else {
    }
    %c0 = arith.constant 0 : index
    %c0_1 = arith.constant 0 : index
    %3 = vector.load %arg3[%c0, %c0_1] : memref<128x384xbf16, #tpu.memory_space<vmem>>, vector<128x384xbf16>
    %c0_2 = arith.constant 0 : index
    %c0_3 = arith.constant 0 : index
    %4 = vector.load %arg4[%c0_2, %c0_3] : memref<1x128xf32, #tpu.memory_space<vmem>>, vector<1x128xf32>
    %c0_4 = arith.constant 0 : index
    %c0_5 = arith.constant 0 : index
    %5 = vector.load %arg8[%c0_4, %c0_5] : memref<8x128xf32, #tpu.memory_space<vmem>>, vector<8x128xf32>
    %c0_i32_6 = arith.constant 0 : i32
    %6 = arith.index_cast %c0_i32_6 : i32 to index
    %c0_7 = arith.constant 0 : index
    %c0_8 = arith.constant 0 : index
    %7 = vector.load %arg1[%6, %c0_7, %c0_8] : memref<1x8x384xf32, #tpu.memory_space<vmem>>, vector<1x8x384xf32>
    %8 = vector.shape_cast %7 : vector<1x8x384xf32> to vector<8x384xf32>
    %9 = arith.truncf %5 : vector<8x128xf32> to vector<8x128xbf16>
    %cst = arith.constant dense<0.000000e+00> : vector<8x384xf32>
    %10 = tpu.matmul %9, %3, %cst {dimension_numbers = #tpu.dot_dimension_numbers<[1], [0], [0], [1], [0, 0, 1, 1], [], []>} : vector<8x128xbf16>, vector<128x384xbf16>, vector<8x384xf32> -> vector<8x384xf32>
    %11 = vector.extract_strided_slice %8 {offsets = [0, 0], sizes = [8, 128], strides = [1, 1]} : vector<8x384xf32> to vector<8x128xf32>
    %12 = vector.extract_strided_slice %10 {offsets = [0, 0], sizes = [8, 128], strides = [1, 1]} : vector<8x384xf32> to vector<8x128xf32>
    %13 = arith.addf %11, %12 : vector<8x128xf32>
    %14 = arith.negf %13 : vector<8x128xf32>
    %15 = math.exp %14 : vector<8x128xf32>
    %cst_9 = arith.constant 1.000000e+00 : f32
    %16 = vector.broadcast %cst_9 : f32 to vector<8x128xf32>
    %17 = arith.addf %16, %15 : vector<8x128xf32>
    %18 = arith.divf %16, %17 : vector<8x128xf32>
    %19 = vector.extract_strided_slice %8 {offsets = [0, 128], sizes = [8, 128], strides = [1, 1]} : vector<8x384xf32> to vector<8x128xf32>
    %20 = vector.extract_strided_slice %10 {offsets = [0, 128], sizes = [8, 128], strides = [1, 1]} : vector<8x384xf32> to vector<8x128xf32>
    %21 = arith.addf %19, %20 : vector<8x128xf32>
    %22 = arith.negf %21 : vector<8x128xf32>
    %23 = math.exp %22 : vector<8x128xf32>
    %cst_10 = arith.constant 1.000000e+00 : f32
    %24 = vector.broadcast %cst_10 : f32 to vector<8x128xf32>
    %25 = arith.addf %24, %23 : vector<8x128xf32>
    %26 = arith.divf %24, %25 : vector<8x128xf32>
    %27 = vector.extract_strided_slice %8 {offsets = [0, 256], sizes = [8, 128], strides = [1, 1]} : vector<8x384xf32> to vector<8x128xf32>
    %28 = vector.extract_strided_slice %10 {offsets = [0, 256], sizes = [8, 128], strides = [1, 1]} : vector<8x384xf32> to vector<8x128xf32>
    %29 = vector.broadcast %4 : vector<1x128xf32> to vector<8x128xf32>
    %30 = arith.addf %28, %29 : vector<8x128xf32>
    %31 = arith.mulf %18, %30 : vector<8x128xf32>
    %32 = arith.addf %27, %31 : vector<8x128xf32>
    %33 = math.tanh %32 : vector<8x128xf32>
    %cst_11 = arith.constant 1.000000e+00 : f32
    %34 = vector.broadcast %cst_11 : f32 to vector<8x128xf32>
    %35 = arith.subf %34, %26 : vector<8x128xf32>
    %36 = arith.mulf %35, %33 : vector<8x128xf32>
    %37 = arith.mulf %26, %5 : vector<8x128xf32>
    %38 = arith.addf %36, %37 : vector<8x128xf32>
    %39 = arith.index_cast %c0_i32_6 : i32 to index
    %c0_12 = arith.constant 0 : index
    %c0_13 = arith.constant 0 : index
    %40 = vector.load %arg9[%39, %c0_12, %c0_13] : memref<1x8x128xf32, #tpu.memory_space<vmem>>, vector<1x8x128xf32>
    %41 = vector.shape_cast %40 : vector<1x8x128xf32> to vector<8x128xf32>
    %42 = vector.shape_cast %38 : vector<8x128xf32> to vector<1x8x128xf32>
    tpu.vector_store %arg9[%39, %c0_12, %c0_13], %42 {strides = array<i32>} : memref<1x8x128xf32, #tpu.memory_space<vmem>>, vector<1x8x128xf32>,
    %c1_i32 = arith.constant 1 : i32
    %c0_14 = arith.constant 0 : index
    %c0_15 = arith.constant 0 : index
    %43 = vector.load %arg8[%c0_14, %c0_15] : memref<8x128xf32, #tpu.memory_space<vmem>>, vector<8x128xf32>
    tpu.vector_store %arg8[%c0_14, %c0_15], %38 {strides = array<i32>} : memref<8x128xf32, #tpu.memory_space<vmem>>, vector<8x128xf32>,
    %c0_16 = arith.constant 0 : index
    %c0_17 = arith.constant 0 : index
    %c0_18 = arith.constant 0 : index
    %44 = vector.load %arg9[%c0_16, %c0_17, %c0_18] : memref<1x8x128xf32, #tpu.memory_space<vmem>>, vector<1x8x128xf32>
    %45 = vector.shape_cast %44 : vector<1x8x128xf32> to vector<8x128xf32>
    %46 = arith.truncf %45 : vector<8x128xf32> to vector<8x128xbf16>
    %c0_19 = arith.constant 0 : index
    %c0_20 = arith.constant 0 : index
    %47 = vector.load %arg5[%c0_19, %c0_20] : memref<128x128xbf16, #tpu.memory_space<vmem>>, vector<128x128xbf16>
    %cst_21 = arith.constant dense<0.000000e+00> : vector<8x128xf32>
    %48 = tpu.matmul %46, %47, %cst_21 {dimension_numbers = #tpu.dot_dimension_numbers<[1], [0], [0], [1], [0, 0, 1, 1], [], []>} : vector<8x128xbf16>, vector<128x128xbf16>, vector<8x128xf32> -> vector<8x128xf32>
    %c0_22 = arith.constant 0 : index
    %c0_23 = arith.constant 0 : index
    %49 = vector.load %arg6[%c0_22, %c0_23] : memref<1x128xf32, #tpu.memory_space<vmem>>, vector<1x128xf32>
    %50 = vector.broadcast %49 : vector<1x128xf32> to vector<8x128xf32>
    %51 = arith.addf %48, %50 : vector<8x128xf32>
    %52 = vector.shape_cast %51 : vector<8x128xf32> to vector<1x8x128xf32>
    %c0_24 = arith.constant 0 : index
    %c0_25 = arith.constant 0 : index
    %c0_26 = arith.constant 0 : index
    %53 = vector.load %arg7[%c0_24, %c0_25, %c0_26] : memref<1x8x128xf32, #tpu.memory_space<vmem>>, vector<1x8x128xf32>
    tpu.vector_store %arg7[%c0_24, %c0_25, %c0_26], %52 {strides = array<i32>} : memref<1x8x128xf32, #tpu.memory_space<vmem>>, vector<1x8x128xf32>,
    return
  }
  func.func @transform_0(%arg0: i32) -> (i32, i32, i32) {
    %c0_i32 = arith.constant 0 : i32
    %c0_i32_0 = arith.constant 0 : i32
    %c0_i32_1 = arith.constant 0 : i32
    return %arg0, %c0_i32, %c0_i32_0 : i32, i32, i32
  }
  func.func @transform_1(%arg0: i32) -> (i32, i32) {
    %c0_i32 = arith.constant 0 : i32
    %c0_i32_0 = arith.constant 0 : i32
    %c0_i32_1 = arith.constant 0 : i32
    return %c0_i32, %c0_i32_0 : i32, i32
  }
  func.func @transform_2(%arg0: i32) -> (i32, i32) {
    %c0_i32 = arith.constant 0 : i32
    %c0_i32_0 = arith.constant 0 : i32
    %c0_i32_1 = arith.constant 0 : i32
    return %c0_i32, %c0_i32_0 : i32, i32
  }
  func.func @transform_3(%arg0: i32) -> (i32, i32) {
    %c0_i32 = arith.constant 0 : i32
    %c0_i32_0 = arith.constant 0 : i32
    %c0_i32_1 = arith.constant 0 : i32
    return %c0_i32, %c0_i32_0 : i32, i32
  }
  func.func @transform_4(%arg0: i32) -> (i32, i32) {
    %c0_i32 = arith.constant 0 : i32
    %c0_i32_0 = arith.constant 0 : i32
    %c0_i32_1 = arith.constant 0 : i32
    return %c0_i32, %c0_i32_0 : i32, i32
  }
  func.func @transform_5(%arg0: i32) -> (i32, i32) {
    %c0_i32 = arith.constant 0 : i32
    %c0_i32_0 = arith.constant 0 : i32
    %c0_i32_1 = arith.constant 0 : i32
    return %c0_i32, %c0_i32_0 : i32, i32
  }
  func.func @transform_6(%arg0: i32) -> (i32, i32, i32) {
    %c0_i32 = arith.constant 0 : i32
    %c0_i32_0 = arith.constant 0 : i32
    %c0_i32_1 = arith.constant 0 : i32
    return %arg0, %c0_i32, %c0_i32_0 : i32, i32, i32
  }
  func.func @transform_7(%arg0: i32) -> (i32, i32) {
    %c0_i32 = arith.constant 0 : i32
    %c0_i32_0 = arith.constant 0 : i32
    %c0_i32_1 = arith.constant 0 : i32
    return %c0_i32, %c0_i32_0 : i32, i32
  }
}

</mosaic_0001>

<bundles_post_ra>
// kernel: char_rnn_forward_seq.1
= control target key start
LH: loop header
LB: loop body
LE: loop exit
PB: predicated region body
PF: predicated region fallthrough
CT: control target
= control target key end

     0   :  { %13 = vsyncpa [#allocation4], 0  ;;  %s601_s27 = smov [#allocation3]   ;;  %s602_s29 = smov 192   ;;  %s700_s0 = inlined_call_operand.vmem [shape: f32[1,8,384], index: 0, kind: input, shape index: {}]   ;;  %s701_s1 = inlined_call_operand.vmem [shape: f32[8,128], index: 1, kind: input, shape index: {}]   ;;  %s702_s2 = inlined_call_operand.hbm [shape: bf16[128,384], index: 2, kind: input, shape index: {}]   ;;  %s703_s3 = inlined_call_operand.vmem [shape: f32[1,128], index: 3, kind: input, shape index: {}]   ;;  %s704_s4 = inlined_call_operand.vmem [shape: bf16[128,128], index: 4, kind: input, shape index: {}]   ;;  %s705_s5 = inlined_call_operand.vmem [shape: f32[1,128], index: 5, kind: input, shape index: {}]   ;;  %s706_s6 = inlined_call_operand.vmem [shape: f32[1,8,128], index: 6, kind: output, shape index: {0}]   ;;  %s707_s7 = inlined_call_operand.vmem [shape: f32[8,128], index: 7, kind: output, shape index: {1}]  }
   0x1   :  { %s22_s26 = sshll.u32 %s702_s2, 4  ;;  %s24_s28 = sshll.u32 %s601_s27, 4  ;;  %s23_s26 = int_to_ptr.hbm [resolvable:$true] %s22_s26  ;;  %s25_s28 = int_to_ptr.vmem [resolvable:$true] %s24_s28 }
   0x2   :  { %s603_s30 = smov 12  }
   0x3   :  { %30 = dma.hbm_to_vmem [thread:$0]  %s23_s26, 3072, %s25_s28, [#allocation4], %s602_s29, %s602_s29, %s603_s30  }
   0x4   :  { %599 = dma.done.wait [#allocation4], 3072  }
   0x5   :  { %600 = vsyncadd [#allocation4], 4294964224  ;;  %v484_v0 = vld [vmem:[#allocation3 + $0xa8] sm:$0xf]  ;;  %v550_v1 = vld [vmem:[#allocation3 + $0xb0] sm:$0xf0] }
   0x6   :  { %v549_v2 = vld [vmem:[#allocation3 + $0xac] sm:$0xf]  ;;  %v485_v3 = vor.u32 %v550_v1, %v484_v0  ;;  %v486_v4 = vld [vmem:[#allocation3 + $0xb4] sm:$0xf0]  ;;  %v472_v5 = vld [vmem:[#allocation3 + $0x90] sm:$0xf] }
   0x7   :  { %v547_v6 = vld [vmem:[#allocation3 + $0x98] sm:$0xf0]  ;;  %v489_v7 = vor.u32 %v549_v2, %v486_v4  ;;  %v546_v8 = vld [vmem:[#allocation3 + $0x94] sm:$0xf]  ;;  %v474_v9 = vld [vmem:[#allocation3 + $0x9c] sm:$0xf0] }
   0x8   :  { %213 = vmatpush.bf16.msra.mxu0 %v485_v3  ;;  %v473_v10 = vor.u32 %v547_v6, %v472_v5  ;;  %v477_v11 = vor.u32 %v546_v8, %v474_v9  ;;  %v460_v12 = vld [vmem:[#allocation3 + $0x78] sm:$0xf]  ;;  %v544_v13 = vld [vmem:[#allocation3 + $0x80] sm:$0xf0]  ;;  %v543_v14 = vld [vmem:[#allocation3 + $0x7c] sm:$0xf] }
   0x9   :  { %226 = vmatpush.bf16.msra.mxu1 %v489_v7  ;;  %v462_v15 = vld [vmem:[#allocation3 + $0x84] sm:$0xf0]  ;;  %v492_v16 = vld [vmem:[#allocation3 + $0xb0] sm:$0xf]  ;;  %v551_v17 = vld [vmem:[#allocation3 + $0xb8] sm:$0xf0]  ;;  %v461_v19 = vor.u32 %v544_v13, %v460_v12 }
   0xa   :  { %v493_v18 = vor.u32 %v551_v17, %v492_v16  ;;  %v480_v20 = vld [vmem:[#allocation3 + $0x98] sm:$0xf]  ;;  %v548_v21 = vld [vmem:[#allocation3 + $0xa0] sm:$0xf0]  ;;  %v465_v22 = vor.u32 %v543_v14, %v462_v15  ;;  %v448_v23 = vld [vmem:[#allocation3 + $0x60] sm:$0xf] }
   0xb   :  { %v541_v24 = vld [vmem:[#allocation3 + $0x68] sm:$0xf0]  ;;  %v540_v25 = vld [vmem:[#allocation3 + $0x64] sm:$0xf]  ;;  %v481_v26 = vor.u32 %v548_v21, %v480_v20  ;;  %v450_v27 = vld [vmem:[#allocation3 + $0x6c] sm:$0xf0] }
   0xc   :  { %214 = vmatpush.bf16.msra.mxu0 %v473_v10  ;;  %239 = vmatpush.bf16.msra.mxu2 %v493_v18  ;;  %v468_v28 = vld [vmem:[#allocation3 + $0x80] sm:$0xf]  ;;  %v545_v29 = vld [vmem:[#allocation3 + $0x88] sm:$0xf0]  ;;  %v449_v30 = vor.u32 %v541_v24, %v448_v23  ;;  %v453_v31 = vor.u32 %v540_v25, %v450_v27  ;;  %v436_v32 = vld [vmem:[#allocation3 + $0x48] sm:$0xf] }
   0xd   :  { %227 = vmatpush.bf16.msra.mxu1 %v477_v11  ;;  %v538_v33 = vld [vmem:[#allocation3 + $0x50] sm:$0xf0]  ;;  %v537_v34 = vld [vmem:[#allocation3 + $0x4c] sm:$0xf]  ;;  %v469_v35 = vor.u32 %v545_v29, %v468_v28  ;;  %v438_v36 = vld [vmem:[#allocation3 + $0x54] sm:$0xf0] }
   0xe   :  { %v456_v37 = vld [vmem:[#allocation3 + $0x68] sm:$0xf]  ;;  %v542_v38 = vld [vmem:[#allocation3 + $0x70] sm:$0xf0]  ;;  %v437_v39 = vor.u32 %v538_v33, %v436_v32  ;;  %v424_v40 = vld [vmem:[#allocation3 + $0x30] sm:$0xf]  ;;  %v441_v42 = vor.u32 %v537_v34, %v438_v36 }
   0xf   :  { %v535_v41 = vld [vmem:[#allocation3 + $0x38] sm:$0xf0]  ;;  %v534_v43 = vld [vmem:[#allocation3 + $0x34] sm:$0xf]  ;;  %v426_v44 = vld [vmem:[#allocation3 + $0x3c] sm:$0xf0]  ;;  %v457_v45 = vor.u32 %v542_v38, %v456_v37 }
  0x10   :  { %215 = vmatpush.bf16.msra.mxu0 %v461_v19  ;;  %240 = vmatpush.bf16.msra.mxu2 %v481_v26  ;;  %v444_v46 = vld [vmem:[#allocation3 + $0x50] sm:$0xf]  ;;  %v539_v47 = vld [vmem:[#allocation3 + $0x58] sm:$0xf0]  ;;  %v425_v48 = vor.u32 %v535_v41, %v424_v40  ;;  %v429_v49 = vor.u32 %v534_v43, %v426_v44  ;;  %v412_v50 = vld [vmem:[#allocation3 + $0x18] sm:$0xf] }
  0x11   :  { %228 = vmatpush.bf16.msra.mxu1 %v465_v22  ;;  %v532_v51 = vld [vmem:[#allocation3 + $0x20] sm:$0xf0]  ;;  %v531_v52 = vld [vmem:[#allocation3 + $0x1c] sm:$0xf]  ;;  %v445_v53 = vor.u32 %v539_v47, %v444_v46  ;;  %v414_v54 = vld [vmem:[#allocation3 + $0x24] sm:$0xf0] }
  0x12   :  { %v432_v55 = vld [vmem:[#allocation3 + $0x38] sm:$0xf]  ;;  %v536_v56 = vld [vmem:[#allocation3 + $0x40] sm:$0xf0]  ;;  %v413_v57 = vor.u32 %v532_v51, %v412_v50  ;;  %v417_v58 = vor.u32 %v531_v52, %v414_v54  ;;  %v400_v59 = vld [vmem:[#allocation3] sm:$0xf] }
  0x13   :  { %v529_v60 = vld [vmem:[#allocation3 + $0x8] sm:$0xf0]  ;;  %v528_v61 = vld [vmem:[#allocation3 + $0x4] sm:$0xf]  ;;  %v433_v62 = vor.u32 %v536_v56, %v432_v55  ;;  %v402_v63 = vld [vmem:[#allocation3 + $0xc] sm:$0xf0] }
  0x14   :  { %216 = vmatpush.bf16.msra.mxu0 %v449_v30  ;;  %241 = vmatpush.bf16.msra.mxu2 %v469_v35  ;;  %v420_v0 = vld [vmem:[#allocation3 + $0x20] sm:$0xf]  ;;  %v533_v1 = vld [vmem:[#allocation3 + $0x28] sm:$0xf0]  ;;  %v401_v2 = vor.u32 %v529_v60, %v400_v59  ;;  %v405_v4 = vor.u32 %v528_v61, %v402_v63  ;;  %v408_v6 = vld [vmem:[#allocation3 + $0x8] sm:$0xf] }
  0x15   :  { %229 = vmatpush.bf16.msra.mxu1 %v453_v31  ;;  %v650_v3 = vld [vmem:[%s701_s1] sm:$0xff]  ;;  %v421_v5 = vor.u32 %v533_v1, %v420_v0  ;;  %v530_v7 = vld [vmem:[#allocation3 + $0x10] sm:$0xf0]  ;;  %v559_v10 = vld [vmem:[%s704_s4 + $0x38] sm:$0xff] }
  0x16   :  { %v84_v8 = vpack.c.bf16 %v650_v3, %v650_v3  ;;  %v409_v9 = vor.u32 %v530_v7, %v408_v6  ;;  %375 = vmatpush.bf16.msra.mxu3 %v559_v10  ;;  %v558_v11 = vld [vmem:[%s704_s4 + $0x30] sm:$0xff]  ;;  %v557_v12 = vld [vmem:[%s704_s4 + $0x28] sm:$0xff]  ;;  %v556_v13 = vld [vmem:[%s704_s4 + $0x20] sm:$0xff] }
  0x17   :  { %v81_v14 = vld [vmem:[%s700_s0] sm:$0xff]  ;;  %v82_v15 = vld [vmem:[%s700_s0 + $0x8] sm:$0xff]  ;;  %v555_v17 = vld [vmem:[%s704_s4 + $0x18] sm:$0xff] }
  0x18   :  { %217 = vmatpush.bf16.msra.mxu0 %v437_v39  ;;  %242 = vmatpush.bf16.msra.mxu2 %v457_v45  ;;  %v554_v22 = vld [vmem:[%s704_s4 + $0x10] sm:$0xff]  ;;  %v553_v24 = vld [vmem:[%s704_s4 + $0x8] sm:$0xff]  ;;  %v552_v27 = vld [vmem:[%s704_s4] sm:$0xff] }
  0x19   :  { %230 = vmatpush.bf16.msra.mxu1 %v441_v42  ;;  %v563_v39 = vld [vmem:[%s703_s3] ss:$0 sm:$0xff] }
  0x1a   :  { %376 = vmatpush.bf16.msra.mxu3 %v558_v11  ;;  %v564_v1 = vld [vmem:[%s705_s5] ss:$0 sm:$0xff] }
  0x1c   :  { %218 = vmatpush.bf16.msra.mxu0 %v425_v48  ;;  %243 = vmatpush.bf16.msra.mxu2 %v445_v53 }
  0x1d   :  { %231 = vmatpush.bf16.msra.mxu1 %v429_v49  ;;  %v83_v49 = vld [vmem:[%s700_s0 + $0x10] sm:$0xff] }
  0x1e   :  { %377 = vmatpush.bf16.msra.mxu3 %v557_v12 }
  0x20   :  { %219 = vmatpush.bf16.msra.mxu0 %v413_v57  ;;  %244 = vmatpush.bf16.msra.mxu2 %v433_v62 }
  0x21   :  { %232 = vmatpush.bf16.msra.mxu1 %v417_v58 }
  0x22   :  { %378 = vmatpush.bf16.msra.mxu3 %v556_v13 }
  0x24   :  { %220 = vmatpush.bf16.msra.mxu0 %v401_v2  ;;  %245 = vmatpush.bf16.msra.mxu2 %v421_v5 }
  0x25   :  { %233 = vmatpush.bf16.msra.mxu1 %v405_v4 }
  0x26   :  { %379 = vmatpush.bf16.msra.mxu3 %v555_v17 }
  0x27   :  { %221 = vmatmul.bf16.vlgmr.msra.gmra.mxu0 %v84_v8 }
  0x28   :  { %234 = vmatmul.bf16.vlgmr.msra.gmra.mxu1 %v84_v8  ;;  %246 = vmatpush.bf16.msra.mxu2 %v409_v9 }
  0x2a   :  { %380 = vmatpush.bf16.msra.mxu3 %v554_v22 }
  0x2b   :  { %247 = vmatmul.bf16.vlgmr.msra.gmra.mxu2 %v84_v8 }
  0x2e   :  { %381 = vmatpush.bf16.msra.mxu3 %v553_v24 }
  0x32   :  { %382 = vmatpush.bf16.msra.mxu3 %v552_v27 }
  0xa4   :  { %v222_v16 = vpop.f32.mrf.mxu0 }
  0xa5   :  { %v252_v18 = vadd.f32 %v222_v16, %v81_v14  ;;  %v235_v19 = vpop.f32.mrf.mxu1 }
  0xa6   :  { %v272_v20 = vadd.f32 %v235_v19, %v82_v15 }
  0xa7   :  { %v494_v21 = vmul.f32 -1.442695, %v252_v18 }
  0xa8   :  { %v495_v23 = vmul.f32 -1.442695, %v272_v20 }
  0xa9   :  { %565 = vpow2.f32 %v494_v21 }
  0xaa   :  { %567 = vpow2.f32 %v495_v23 }
  0xac   :  { %v224_v25 = vpop.f32.mrf.mxu0 }
  0xad   :  { %v237_v26 = vpop.f32.mrf.mxu1 }
  0xae   :  { %v248_v29 = vpop.f32.mrf.mxu2 }
  0xaf   :  { %v566_v28 = vpop.eup %565  ;;  %v295_v46 = vadd.f32 %v563_v39, %v248_v29 }
  0xb0   :  { %v568_v30 = vpop.eup %567  ;;  %v256_v31 = vadd.f32 1.0, %v566_v28 }
  0xb1   :  { %v276_v32 = vadd.f32 1.0, %v568_v30 }
  0xb2   :  { %569 = vrcp.f32 %v256_v31  ;;  %v268_v41 = vand.u32 2147483648, %v256_v31  ;;  %v266_v43 = vand.u32 2147483647, %v256_v31  ;;  %vm262_vm1 = vweird.f32 %v256_v31 }
  0xb3   :  { %571 = vrcp.f32 %v276_v32  ;;  %vm282_vm4 = vweird.f32 %v276_v32  ;;  %v288_v53 = vand.u32 2147483648, %v276_v32  ;;  %v286_v54 = vand.u32 2147483647, %v276_v32 }
  0xb4   :  { %v269_v47 = vor.u32 1.1754944e-38, %v268_v41  ;;  %vm267_vm3 = vcmp.eq.f32.partialorder %v266_v43, 8.507059e+37 }
  0xb5   :  { %v289_v57 = vor.u32 1.1754944e-38, %v288_v53  ;;  %vm287_vm7 = vcmp.eq.f32.partialorder %v286_v54, 8.507059e+37 }
  0xb6   :  { %v250_v33 = vpop.f32.mrf.mxu2 }
  0xb8   :  { %v570_v34 = vpop.eup %569 }
  0xb9   :  { %v572_v35 = vpop.eup %571  ;;  %v258_v36 = vmul.f32 %v570_v34, %v256_v31  ;;  %vm263_vm0 = vweird.f32 %v570_v34 }
  0xba   :  { %v278_v37 = vmul.f32 %v572_v35, %v276_v32  ;;  %vm264_vm2 = vmor %vm262_vm1, %vm263_vm0  ;;  %vm283_vm5 = vweird.f32 %v572_v35 }
  0xbb   :  { %v259_v38 = vsub.f32 1.0, %v258_v36  ;;  %vm284_vm6 = vmor %vm282_vm4, %vm283_vm5 }
  0xbc   :  { %v279_v40 = vsub.f32 1.0, %v278_v37 }
  0xbd   :  { %v260_v42 = vmul.f32 %v570_v34, %v259_v38 }
  0xbe   :  { %v280_v44 = vmul.f32 %v572_v35, %v279_v40 }
  0xbf   :  { %v261_v45 = vadd.f32 %v570_v34, %v260_v42 }
  0xc0   :  { %v281_v51 = vadd.f32 %v572_v35, %v280_v44 }
  0xc1   :  { %v265_v48 = vsel %vm264_vm2, %v570_v34, %v261_v45 }
  0xc2   :  { %v270_v50 = vsel %vm267_vm3, %v269_v47, %v265_v48  ;;  %v285_v56 = vsel %vm284_vm6, %v572_v35, %v281_v51 }
  0xc3   :  { %v296_v52 = vmul.f32 %v295_v46, %v270_v50  ;;  %v290_v58 = vsel %vm287_vm7, %v289_v57, %v285_v56 }
  0xc4   :  { %v299_v59 = vsub.f32 1.0, %v290_v58  ;;  %v301_v62 = vmul.f32 %v290_v58, %v650_v3 }
  0xc5   :  { %v297_v55 = vadd.f32 %v296_v52, %v83_v49 }
  0xc7   :  { %573 = vtanh.f32 %v297_v55 }
  0xcd   :  { %v574_v60 = vpop.eup %573 }
  0xce   :  { %v300_v61 = vmul.f32 %v574_v60, %v299_v59 }
  0xd0   :  { %v302_v63 = vadd.f32 %v301_v62, %v300_v61 }
  0xd2   :  { %304 = vst [vmem:[%s707_s7] sm:$0xff] %v302_v63  ;;  %v306_v0 = vpack.c.bf16 %v302_v63, %v302_v63 }
  0xd4   :  { %383 = vmatmul.bf16.vlgmr.msra.gmra.mxu3 %v306_v0 }
 0x157   :  { %v384_v2 = vpop.f32.mrf.mxu3 }
 0x158   :  { %v385_v4 = vadd.f32 %v564_v1, %v384_v2 }
 0x15a   :  { %388 = vst [vmem:[%s706_s6] sm:$0xff] %v385_v4 }
 0x15f   :  { %v386_v5 = vpop.f32.mrf.mxu3 }
 0x160   :  { %397 = vsyncpa [#allocation4], 1 }

</bundles_post_ra>
